<compile_context>
chip_gen: v7x
topology: tpu7x:2x2x1
jax: 0.10.0
libtpu: 0.0.40
codegen_flags: <defaults>
</compile_context>

<pallas_src>
import functools

import jax
import jax.numpy as jnp
from jax import lax
from jax.experimental import pallas as pl
from jax.experimental.pallas import tpu as pltpu

SUBLANES = 8
LANES = 128
MAX_BLOCK_SUBLANES = 256           # 256 * 128 = 32768 curves (~1 MiB) per grid step
SMALL_N_PALLAS_THRESHOLD = 4096    # below this, jnp beats pallas dispatch + packing


def _cdiv(a, b):
    return -(-a // b)


def _per_curve_loss(coef, eps, *, use_approx_recip):
    """Elementwise joint loss. coef = (a0,b0,a1,b1,a2,b2,a3,b3), any common shape."""
    a0, b0, a1, b1, a2, b2, a3, b3 = coef

    # Quadratic coefficients of der(t)/3 = A*t^2 + 2*K*t + C, per axis.
    Ax = a3 - 3.0 * a2 + 3.0 * a1 - a0
    Kx = a2 - 2.0 * a1 + a0
    Cx = a1 - a0
    Ay = b3 - 3.0 * b2 + 3.0 * b1 - b0
    Ky = b2 - 2.0 * b1 + b0
    Cy = b1 - b0

    # find_joint axis-swap branch: if Ax == 0 exactly, solve on the y coordinate.
    swap = Ax == 0.0
    # TODO(synk): the torch reference recurses infinitely when Ax==0 and Ay==0 and
    #             divides by zero at cusps (speed == 0); here those curves (and the
    #             padded all-zero curves) simply contribute 0 loss.
    A = jnp.where(swap, Ay, Ax)
    K = jnp.where(swap, Ky, Kx)
    C = jnp.where(swap, Cy, Cx)
    # Power-basis coefficients of the tested ("y") axis: y normally, x when swapped.
    Aq = jnp.where(swap, Ax, Ay)
    Kq3 = 3.0 * jnp.where(swap, Kx, Ky)
    Cq3 = 3.0 * jnp.where(swap, Cx, Cy)
    q0 = jnp.where(swap, a0, b0)

    d1 = K * K - A * C
    valid = (A != 0.0) & (d1 >= 0.0)
    safe_A = jnp.where(A == 0.0, 1.0, A)
    if use_approx_recip:
        # EUP vrcp (otherwise-idle bundle slot) + one Newton-Raphson refinement.
        inv_A = pl.reciprocal(safe_A, approx=True)
        inv_A = inv_A * (2.0 - safe_A * inv_A)
    else:
        inv_A = 1.0 / safe_A
    sq = jnp.sqrt(jnp.maximum(d1, 0.0))
    t1 = (sq - K) * inv_A            # (-K + sqrt(d1)) / A
    t2 = (-sq - K) * inv_A           # (-K - sqrt(d1)) / A

    def bez_y(t):
        # evaluate_curve(t)[tested axis] == Aq*t^3 + 3*Kq*t^2 + 3*Cq*t + q0 (Horner).
        return ((Aq * t + Kq3) * t + Cq3) * t + q0

    def is_extremum(t):
        # is_local_max OR is_local_min; probe distance hard-coded to 0.1 (reference).
        y0 = bez_y(t)
        return (y0 - bez_y(t + 0.1)) * (y0 - bez_y(t - 0.1)) > 0.0

    ok1 = (t1 >= 0.0) & (t1 <= 1.0) & is_extremum(t1)
    ok2 = (t2 >= 0.0) & (t2 <= 1.0) & is_extremum(t2)
    found = valid & (ok1 | ok2)
    t_joint = jnp.where(ok1, t1, t2)     # t1 has priority, matching the reference

    def curvature(t):
        # |curvature| is invariant under the x/y swap, so original coeffs are used.
        u = Ax * t + Kx                  # x''(t) / 6
        v = Ay * t + Ky                  # y''(t) / 6
        px = (u + Kx) * t + Cx           # x'(t) / 3
        py = (v + Ky) * t + Cy           # y'(t) / 3
        num = px * v - u * py            # (x'y'' - x''y') / 18
        s = px * px + py * py            # (x'^2 + y'^2) / 9
        zero = s == 0.0
        r = lax.rsqrt(jnp.where(zero, 1.0, s))
        return jnp.where(zero, 0.0, (2.0 / 3.0) * num * (r * r * r))   # 18/9^1.5 = 2/3

    k_left = curvature(jnp.maximum(t_joint - eps, 0.0))
    k_right = curvature(jnp.minimum(t_joint + eps, 1.0))
    return jnp.where(found, jnp.abs(k_left) + jnp.abs(k_right), 0.0)


def _joint_loss_kernel(pts_ref, out_ref, *, eps, n_chunks):
    # pts_ref: (8, S, 128) -- axis 0 is the coefficient [a0,b0,a1,b1,a2,b2,a3,b3];
    #          curves are sublane/lane-dense along the last two axes.
    # out_ref: (8, 128) partial sum for this curve block (reduced in the wrapper).
    acc = jnp.zeros((SUBLANES, LANES), jnp.float32)
    # Fully-unrolled loop over 8-sublane chunks keeps every temporary a single vreg
    # (~30 live vregs) instead of S/8 vregs per value -> no spills at large S.
    for c in range(n_chunks):
        base = c * SUBLANES
        coef = tuple(pts_ref[j, pl.ds(base, SUBLANES), :] for j in range(8))
        acc = acc + _per_curve_loss(coef, eps, use_approx_recip=True)
    out_ref[...] = acc


def _block_sublanes(n_curves):
    rows = _cdiv(max(n_curves, 1), LANES)
    rows = _cdiv(rows, SUBLANES) * SUBLANES
    return max(SUBLANES, min(MAX_BLOCK_SUBLANES, rows))


@functools.partial(jax.jit, static_argnames=("eps",))
def _joint_loss_pallas(pts, eps):
    """pts: (N, 4, 2) float32 Bezier control points. Returns scalar loss (Pallas)."""
    n = pts.shape[0]
    s = _block_sublanes(n)                     # sublanes per block (multiple of 8)
    block_curves = s * LANES
    n_blk = max(1, _cdiv(n, block_curves))
    n_pad = n_blk * block_curves

    # Single-pass packing: (N,4,2) -> (N,8) view -> pad rows -> one transpose to a
    # coefficient-major, lane/sublane-dense (n_blk, 8, S, 128) layout.
    flat = pts.reshape(n, 8)
    flat = jnp.pad(flat, ((0, n_pad - n), (0, 0)))
    packed = flat.reshape(n_blk, s, LANES, 8).transpose(0, 3, 1, 2)

    partial = pl.pallas_call(
        functools.partial(_joint_loss_kernel, eps=float(eps), n_chunks=s // SUBLANES),
        out_shape=jax.ShapeDtypeStruct((n_blk, SUBLANES, LANES), jnp.float32),
        grid_spec=pltpu.PrefetchScalarGridSpec(
            num_scalar_prefetch=0,
            grid=(n_blk,),
            in_specs=[pl.BlockSpec((None, 8, s, LANES), lambda g: (g, 0, 0, 0))],
            out_specs=pl.BlockSpec((None, SUBLANES, LANES), lambda g: (g, 0, 0)),
        ),
        # Each grid step writes a disjoint partial-sum block -> "parallel" lets v7x
        # shard curve blocks across its two TensorCores (no-op on v5e/v6e).
        compiler_params=pltpu.CompilerParams(dimension_semantics=("parallel",)),
    )(packed)
    # Padded all-zero curves contribute exactly 0, so a plain sum is correct.
    return jnp.sum(partial)


@functools.partial(jax.jit, static_argnames=("eps",))
def _joint_loss_jnp(pts, eps):
    """Pure-jnp path: small-N fast path and in-script reference for cross-checking."""
    flat = pts.reshape(pts.shape[0], 8)
    coef = tuple(flat[:, j] for j in range(8))
    return jnp.sum(_per_curve_loss(coef, float(eps), use_approx_recip=False))


def joint_loss_forward(x_list, eps=0.1, use_pallas=None):
    """x_list: list of (4,2) arrays or a stacked (N,4,2) array. Returns scalar loss."""
    if isinstance(x_list, (list, tuple)):
        pts = jnp.stack([jnp.asarray(x, jnp.float32) for x in x_list], axis=0)
    else:
        pts = jnp.asarray(x_list, jnp.float32)
    assert pts.ndim == 3 and pts.shape[1:] == (4, 2)
    if use_pallas is None:
        use_pallas = pts.shape[0] >= SMALL_N_PALLAS_THRESHOLD
    if use_pallas:
        return _joint_loss_pallas(pts, eps=float(eps))
    return _joint_loss_jnp(pts, eps=float(eps))


if __name__ == "__main__":
    key = jax.random.PRNGKey(0)
    k1, k2 = jax.random.split(key)

    # Small batch: the module's typical use (a short list of (4,2) Bezier curves).
    x_small = jax.random.normal(k1, (8, 4, 2), dtype=jnp.float32)
    loss_pallas = jax.block_until_ready(joint_loss_forward(x_small, eps=0.1, use_pallas=True))
    loss_ref = jax.block_until_ready(joint_loss_forward(x_small, eps=0.1, use_pallas=False))
    assert loss_pallas.shape == () and loss_pallas.dtype == jnp.float32
    assert bool(jnp.isfinite(loss_pallas))
    assert abs(float(loss_pallas) - float(loss_ref)) <= 2e-3 * max(1.0, abs(float(loss_ref)))

    # Moderate batch exercising the multi-chunk kernel path + row padding.
    x_big = jax.random.normal(k2, (1500, 4, 2), dtype=jnp.float32)
    big_pallas = jax.block_until_ready(joint_loss_forward(x_big, eps=0.1, use_pallas=True))
    big_ref = jax.block_until_ready(joint_loss_forward(x_big, eps=0.1, use_pallas=False))
    assert bool(jnp.isfinite(big_pallas))
    assert abs(float(big_pallas) - float(big_ref)) <= 2e-3 * max(1.0, abs(float(big_ref)))

    print("KERNEL_OK")
</pallas_src>

<mosaic_0001>
module attributes {stable_mosaic.version = 11 : i64} {
  func.func @_joint_loss_kernel(%arg0: i32, %arg1: memref<1x8x8x128xf32, #tpu.memory_space<vmem>>, %arg2: memref<1x8x128xf32, #tpu.memory_space<vmem>>) attributes {dimension_semantics = [#tpu.dimension_semantics<parallel>], iteration_bounds = array<i64: 1>, scalar_prefetch = 0 : i64, scratch_operands = 0 : i64, tpu.core_type = #tpu.core_type<tc>, window_params = [{transform_indices = @transform_0, window_bounds = array<i64: 1, 8, 8, 128>}, {transform_indices = @transform_1, window_bounds = array<i64: 1, 8, 128>}]} {
    %cst = arith.constant 0.000000e+00 : f32
    %0 = vector.broadcast %cst : f32 to vector<8x128xf32>
    %c0 = arith.constant 0 : index
    %c0_0 = arith.constant 0 : index
    %c0_1 = arith.constant 0 : index
    %c0_2 = arith.constant 0 : index
    %1 = vector.load %arg1[%c0, %c0_0, %c0_1, %c0_2] : memref<1x8x8x128xf32, #tpu.memory_space<vmem>>, vector<1x1x8x128xf32>
    %2 = vector.shape_cast %1 : vector<1x1x8x128xf32> to vector<8x128xf32>
    %c0_3 = arith.constant 0 : index
    %c1 = arith.constant 1 : index
    %c0_4 = arith.constant 0 : index
    %c0_5 = arith.constant 0 : index
    %3 = vector.load %arg1[%c0_3, %c1, %c0_4, %c0_5] : memref<1x8x8x128xf32, #tpu.memory_space<vmem>>, vector<1x1x8x128xf32>
    %4 = vector.shape_cast %3 : vector<1x1x8x128xf32> to vector<8x128xf32>
    %c0_6 = arith.constant 0 : index
    %c2 = arith.constant 2 : index
    %c0_7 = arith.constant 0 : index
    %c0_8 = arith.constant 0 : index
    %5 = vector.load %arg1[%c0_6, %c2, %c0_7, %c0_8] : memref<1x8x8x128xf32, #tpu.memory_space<vmem>>, vector<1x1x8x128xf32>
    %6 = vector.shape_cast %5 : vector<1x1x8x128xf32> to vector<8x128xf32>
    %c0_9 = arith.constant 0 : index
    %c3 = arith.constant 3 : index
    %c0_10 = arith.constant 0 : index
    %c0_11 = arith.constant 0 : index
    %7 = vector.load %arg1[%c0_9, %c3, %c0_10, %c0_11] : memref<1x8x8x128xf32, #tpu.memory_space<vmem>>, vector<1x1x8x128xf32>
    %8 = vector.shape_cast %7 : vector<1x1x8x128xf32> to vector<8x128xf32>
    %c0_12 = arith.constant 0 : index
    %c4 = arith.constant 4 : index
    %c0_13 = arith.constant 0 : index
    %c0_14 = arith.constant 0 : index
    %9 = vector.load %arg1[%c0_12, %c4, %c0_13, %c0_14] : memref<1x8x8x128xf32, #tpu.memory_space<vmem>>, vector<1x1x8x128xf32>
    %10 = vector.shape_cast %9 : vector<1x1x8x128xf32> to vector<8x128xf32>
    %c0_15 = arith.constant 0 : index
    %c5 = arith.constant 5 : index
    %c0_16 = arith.constant 0 : index
    %c0_17 = arith.constant 0 : index
    %11 = vector.load %arg1[%c0_15, %c5, %c0_16, %c0_17] : memref<1x8x8x128xf32, #tpu.memory_space<vmem>>, vector<1x1x8x128xf32>
    %12 = vector.shape_cast %11 : vector<1x1x8x128xf32> to vector<8x128xf32>
    %c0_18 = arith.constant 0 : index
    %c6 = arith.constant 6 : index
    %c0_19 = arith.constant 0 : index
    %c0_20 = arith.constant 0 : index
    %13 = vector.load %arg1[%c0_18, %c6, %c0_19, %c0_20] : memref<1x8x8x128xf32, #tpu.memory_space<vmem>>, vector<1x1x8x128xf32>
    %14 = vector.shape_cast %13 : vector<1x1x8x128xf32> to vector<8x128xf32>
    %c0_21 = arith.constant 0 : index
    %c7 = arith.constant 7 : index
    %c0_22 = arith.constant 0 : index
    %c0_23 = arith.constant 0 : index
    %15 = vector.load %arg1[%c0_21, %c7, %c0_22, %c0_23] : memref<1x8x8x128xf32, #tpu.memory_space<vmem>>, vector<1x1x8x128xf32>
    %16 = vector.shape_cast %15 : vector<1x1x8x128xf32> to vector<8x128xf32>
    %cst_24 = arith.constant 3.000000e+00 : f32
    %17 = vector.broadcast %cst_24 : f32 to vector<8x128xf32>
    %18 = arith.mulf %17, %10 : vector<8x128xf32>
    %19 = arith.subf %14, %18 : vector<8x128xf32>
    %cst_25 = arith.constant 3.000000e+00 : f32
    %20 = vector.broadcast %cst_25 : f32 to vector<8x128xf32>
    %21 = arith.mulf %20, %6 : vector<8x128xf32>
    %22 = arith.addf %19, %21 : vector<8x128xf32>
    %23 = arith.subf %22, %2 : vector<8x128xf32>
    %cst_26 = arith.constant 2.000000e+00 : f32
    %24 = vector.broadcast %cst_26 : f32 to vector<8x128xf32>
    %25 = arith.mulf %24, %6 : vector<8x128xf32>
    %26 = arith.subf %10, %25 : vector<8x128xf32>
    %27 = arith.addf %26, %2 : vector<8x128xf32>
    %28 = arith.subf %6, %2 : vector<8x128xf32>
    %cst_27 = arith.constant 3.000000e+00 : f32
    %29 = vector.broadcast %cst_27 : f32 to vector<8x128xf32>
    %30 = arith.mulf %29, %12 : vector<8x128xf32>
    %31 = arith.subf %16, %30 : vector<8x128xf32>
    %cst_28 = arith.constant 3.000000e+00 : f32
    %32 = vector.broadcast %cst_28 : f32 to vector<8x128xf32>
    %33 = arith.mulf %32, %8 : vector<8x128xf32>
    %34 = arith.addf %31, %33 : vector<8x128xf32>
    %35 = arith.subf %34, %4 : vector<8x128xf32>
    %cst_29 = arith.constant 2.000000e+00 : f32
    %36 = vector.broadcast %cst_29 : f32 to vector<8x128xf32>
    %37 = arith.mulf %36, %8 : vector<8x128xf32>
    %38 = arith.subf %12, %37 : vector<8x128xf32>
    %39 = arith.addf %38, %4 : vector<8x128xf32>
    %40 = arith.subf %8, %4 : vector<8x128xf32>
    %cst_30 = arith.constant 0.000000e+00 : f32
    %41 = vector.broadcast %cst_30 : f32 to vector<8x128xf32>
    %42 = arith.cmpf oeq, %23, %41 : vector<8x128xf32>
    %43 = arith.select %42, %35, %23 : vector<8x128xi1>, vector<8x128xf32>
    %44 = arith.select %42, %39, %27 : vector<8x128xi1>, vector<8x128xf32>
    %45 = arith.select %42, %40, %28 : vector<8x128xi1>, vector<8x128xf32>
    %46 = arith.select %42, %23, %35 : vector<8x128xi1>, vector<8x128xf32>
    %47 = arith.select %42, %27, %39 : vector<8x128xi1>, vector<8x128xf32>
    %cst_31 = arith.constant 3.000000e+00 : f32
    %48 = vector.broadcast %cst_31 : f32 to vector<8x128xf32>
    %49 = arith.mulf %48, %47 : vector<8x128xf32>
    %50 = arith.select %42, %28, %40 : vector<8x128xi1>, vector<8x128xf32>
    %cst_32 = arith.constant 3.000000e+00 : f32
    %51 = vector.broadcast %cst_32 : f32 to vector<8x128xf32>
    %52 = arith.mulf %51, %50 : vector<8x128xf32>
    %53 = arith.select %42, %2, %4 : vector<8x128xi1>, vector<8x128xf32>
    %54 = arith.mulf %44, %44 : vector<8x128xf32>
    %55 = arith.mulf %43, %45 : vector<8x128xf32>
    %56 = arith.subf %54, %55 : vector<8x128xf32>
    %cst_33 = arith.constant 0.000000e+00 : f32
    %57 = vector.broadcast %cst_33 : f32 to vector<8x128xf32>
    %58 = arith.cmpf one, %43, %57 : vector<8x128xf32>
    %cst_34 = arith.constant 0.000000e+00 : f32
    %59 = vector.broadcast %cst_34 : f32 to vector<8x128xf32>
    %60 = arith.cmpf oge, %56, %59 : vector<8x128xf32>
    %61 = arith.andi %58, %60 : vector<8x128xi1>
    %cst_35 = arith.constant 0.000000e+00 : f32
    %62 = vector.broadcast %cst_35 : f32 to vector<8x128xf32>
    %63 = arith.cmpf oeq, %43, %62 : vector<8x128xf32>
    %cst_36 = arith.constant 1.000000e+00 : f32
    %64 = vector.broadcast %cst_36 : f32 to vector<8x128xf32>
    %65 = arith.select %63, %64, %43 : vector<8x128xi1>, vector<8x128xf32>
    %66 = tpu.reciprocal %65 {approx = true} : vector<8x128xf32> -> vector<8x128xf32>
    %67 = arith.mulf %65, %66 : vector<8x128xf32>
    %cst_37 = arith.constant 2.000000e+00 : f32
    %68 = vector.broadcast %cst_37 : f32 to vector<8x128xf32>
    %69 = arith.subf %68, %67 : vector<8x128xf32>
    %70 = arith.mulf %66, %69 : vector<8x128xf32>
    %cst_38 = arith.constant 0.000000e+00 : f32
    %71 = vector.broadcast %cst_38 : f32 to vector<8x128xf32>
    %72 = arith.maximumf %56, %71 : vector<8x128xf32>
    %73 = math.sqrt %72 : vector<8x128xf32>
    %74 = arith.subf %73, %44 : vector<8x128xf32>
    %75 = arith.mulf %74, %70 : vector<8x128xf32>
    %cst_39 = arith.constant 0.000000e+00 : f32
    %76 = vector.broadcast %cst_39 : f32 to vector<8x128xf32>
    %77 = arith.subf %76, %73 : vector<8x128xf32>
    %78 = arith.subf %77, %44 : vector<8x128xf32>
    %79 = arith.mulf %78, %70 : vector<8x128xf32>
    %cst_40 = arith.constant 0.000000e+00 : f32
    %80 = vector.broadcast %cst_40 : f32 to vector<8x128xf32>
    %81 = arith.cmpf oge, %75, %80 : vector<8x128xf32>
    %cst_41 = arith.constant 1.000000e+00 : f32
    %82 = vector.broadcast %cst_41 : f32 to vector<8x128xf32>
    %83 = arith.cmpf ole, %75, %82 : vector<8x128xf32>
    %84 = arith.andi %81, %83 : vector<8x128xi1>
    %85 = arith.mulf %46, %75 : vector<8x128xf32>
    %86 = arith.addf %85, %49 : vector<8x128xf32>
    %87 = arith.mulf %86, %75 : vector<8x128xf32>
    %88 = arith.addf %87, %52 : vector<8x128xf32>
    %89 = arith.mulf %88, %75 : vector<8x128xf32>
    %90 = arith.addf %89, %53 : vector<8x128xf32>
    %cst_42 = arith.constant 1.000000e-01 : f32
    %91 = vector.broadcast %cst_42 : f32 to vector<8x128xf32>
    %92 = arith.addf %75, %91 : vector<8x128xf32>
    %93 = arith.mulf %46, %92 : vector<8x128xf32>
    %94 = arith.addf %93, %49 : vector<8x128xf32>
    %95 = arith.mulf %94, %92 : vector<8x128xf32>
    %96 = arith.addf %95, %52 : vector<8x128xf32>
    %97 = arith.mulf %96, %92 : vector<8x128xf32>
    %98 = arith.addf %97, %53 : vector<8x128xf32>
    %99 = arith.subf %90, %98 : vector<8x128xf32>
    %cst_43 = arith.constant 1.000000e-01 : f32
    %100 = vector.broadcast %cst_43 : f32 to vector<8x128xf32>
    %101 = arith.subf %75, %100 : vector<8x128xf32>
    %102 = arith.mulf %46, %101 : vector<8x128xf32>
    %103 = arith.addf %102, %49 : vector<8x128xf32>
    %104 = arith.mulf %103, %101 : vector<8x128xf32>
    %105 = arith.addf %104, %52 : vector<8x128xf32>
    %106 = arith.mulf %105, %101 : vector<8x128xf32>
    %107 = arith.addf %106, %53 : vector<8x128xf32>
    %108 = arith.subf %90, %107 : vector<8x128xf32>
    %109 = arith.mulf %99, %108 : vector<8x128xf32>
    %cst_44 = arith.constant 0.000000e+00 : f32
    %110 = vector.broadcast %cst_44 : f32 to vector<8x128xf32>
    %111 = arith.cmpf ogt, %109, %110 : vector<8x128xf32>
    %112 = arith.andi %84, %111 : vector<8x128xi1>
    %cst_45 = arith.constant 0.000000e+00 : f32
    %113 = vector.broadcast %cst_45 : f32 to vector<8x128xf32>
    %114 = arith.cmpf oge, %79, %113 : vector<8x128xf32>
    %cst_46 = arith.constant 1.000000e+00 : f32
    %115 = vector.broadcast %cst_46 : f32 to vector<8x128xf32>
    %116 = arith.cmpf ole, %79, %115 : vector<8x128xf32>
    %117 = arith.andi %114, %116 : vector<8x128xi1>
    %118 = arith.mulf %46, %79 : vector<8x128xf32>
    %119 = arith.addf %118, %49 : vector<8x128xf32>
    %120 = arith.mulf %119, %79 : vector<8x128xf32>
    %121 = arith.addf %120, %52 : vector<8x128xf32>
    %122 = arith.mulf %121, %79 : vector<8x128xf32>
    %123 = arith.addf %122, %53 : vector<8x128xf32>
    %cst_47 = arith.constant 1.000000e-01 : f32
    %124 = vector.broadcast %cst_47 : f32 to vector<8x128xf32>
    %125 = arith.addf %79, %124 : vector<8x128xf32>
    %126 = arith.mulf %46, %125 : vector<8x128xf32>
    %127 = arith.addf %126, %49 : vector<8x128xf32>
    %128 = arith.mulf %127, %125 : vector<8x128xf32>
    %129 = arith.addf %128, %52 : vector<8x128xf32>
    %130 = arith.mulf %129, %125 : vector<8x128xf32>
    %131 = arith.addf %130, %53 : vector<8x128xf32>
    %132 = arith.subf %123, %131 : vector<8x128xf32>
    %cst_48 = arith.constant 1.000000e-01 : f32
    %133 = vector.broadcast %cst_48 : f32 to vector<8x128xf32>
    %134 = arith.subf %79, %133 : vector<8x128xf32>
    %135 = arith.mulf %46, %134 : vector<8x128xf32>
    %136 = arith.addf %135, %49 : vector<8x128xf32>
    %137 = arith.mulf %136, %134 : vector<8x128xf32>
    %138 = arith.addf %137, %52 : vector<8x128xf32>
    %139 = arith.mulf %138, %134 : vector<8x128xf32>
    %140 = arith.addf %139, %53 : vector<8x128xf32>
    %141 = arith.subf %123, %140 : vector<8x128xf32>
    %142 = arith.mulf %132, %141 : vector<8x128xf32>
    %cst_49 = arith.constant 0.000000e+00 : f32
    %143 = vector.broadcast %cst_49 : f32 to vector<8x128xf32>
    %144 = arith.cmpf ogt, %142, %143 : vector<8x128xf32>
    %145 = arith.andi %117, %144 : vector<8x128xi1>
    %146 = arith.ori %112, %145 : vector<8x128xi1>
    %147 = arith.andi %61, %146 : vector<8x128xi1>
    %148 = arith.select %112, %75, %79 : vector<8x128xi1>, vector<8x128xf32>
    %cst_50 = arith.constant 1.000000e-01 : f32
    %149 = vector.broadcast %cst_50 : f32 to vector<8x128xf32>
    %150 = arith.subf %148, %149 : vector<8x128xf32>
    %cst_51 = arith.constant 0.000000e+00 : f32
    %151 = vector.broadcast %cst_51 : f32 to vector<8x128xf32>
    %152 = arith.maximumf %150, %151 : vector<8x128xf32>
    %153 = arith.mulf %23, %152 : vector<8x128xf32>
    %154 = arith.addf %153, %27 : vector<8x128xf32>
    %155 = arith.mulf %35, %152 : vector<8x128xf32>
    %156 = arith.addf %155, %39 : vector<8x128xf32>
    %157 = arith.addf %154, %27 : vector<8x128xf32>
    %158 = arith.mulf %157, %152 : vector<8x128xf32>
    %159 = arith.addf %158, %28 : vector<8x128xf32>
    %160 = arith.addf %156, %39 : vector<8x128xf32>
    %161 = arith.mulf %160, %152 : vector<8x128xf32>
    %162 = arith.addf %161, %40 : vector<8x128xf32>
    %163 = arith.mulf %159, %156 : vector<8x128xf32>
    %164 = arith.mulf %154, %162 : vector<8x128xf32>
    %165 = arith.subf %163, %164 : vector<8x128xf32>
    %166 = arith.mulf %159, %159 : vector<8x128xf32>
    %167 = arith.mulf %162, %162 : vector<8x128xf32>
    %168 = arith.addf %166, %167 : vector<8x128xf32>
    %cst_52 = arith.constant 0.000000e+00 : f32
    %169 = vector.broadcast %cst_52 : f32 to vector<8x128xf32>
    %170 = arith.cmpf oeq, %168, %169 : vector<8x128xf32>
    %cst_53 = arith.constant 1.000000e+00 : f32
    %171 = vector.broadcast %cst_53 : f32 to vector<8x128xf32>
    %172 = arith.select %170, %171, %168 : vector<8x128xi1>, vector<8x128xf32>
    %173 = math.rsqrt %172 : vector<8x128xf32>
    %cst_54 = arith.constant 0.666666686 : f32
    %174 = vector.broadcast %cst_54 : f32 to vector<8x128xf32>
    %175 = arith.mulf %174, %165 : vector<8x128xf32>
    %176 = arith.mulf %173, %173 : vector<8x128xf32>
    %177 = arith.mulf %176, %173 : vector<8x128xf32>
    %178 = arith.mulf %175, %177 : vector<8x128xf32>
    %cst_55 = arith.constant 0.000000e+00 : f32
    %179 = vector.broadcast %cst_55 : f32 to vector<8x128xf32>
    %180 = arith.select %170, %179, %178 : vector<8x128xi1>, vector<8x128xf32>
    %cst_56 = arith.constant 1.000000e-01 : f32
    %181 = vector.broadcast %cst_56 : f32 to vector<8x128xf32>
    %182 = arith.addf %148, %181 : vector<8x128xf32>
    %cst_57 = arith.constant 1.000000e+00 : f32
    %183 = vector.broadcast %cst_57 : f32 to vector<8x128xf32>
    %184 = arith.minimumf %182, %183 : vector<8x128xf32>
    %185 = arith.mulf %23, %184 : vector<8x128xf32>
    %186 = arith.addf %185, %27 : vector<8x128xf32>
    %187 = arith.mulf %35, %184 : vector<8x128xf32>
    %188 = arith.addf %187, %39 : vector<8x128xf32>
    %189 = arith.addf %186, %27 : vector<8x128xf32>
    %190 = arith.mulf %189, %184 : vector<8x128xf32>
    %191 = arith.addf %190, %28 : vector<8x128xf32>
    %192 = arith.addf %188, %39 : vector<8x128xf32>
    %193 = arith.mulf %192, %184 : vector<8x128xf32>
    %194 = arith.addf %193, %40 : vector<8x128xf32>
    %195 = arith.mulf %191, %188 : vector<8x128xf32>
    %196 = arith.mulf %186, %194 : vector<8x128xf32>
    %197 = arith.subf %195, %196 : vector<8x128xf32>
    %198 = arith.mulf %191, %191 : vector<8x128xf32>
    %199 = arith.mulf %194, %194 : vector<8x128xf32>
    %200 = arith.addf %198, %199 : vector<8x128xf32>
    %cst_58 = arith.constant 0.000000e+00 : f32
    %201 = vector.broadcast %cst_58 : f32 to vector<8x128xf32>
    %202 = arith.cmpf oeq, %200, %201 : vector<8x128xf32>
    %cst_59 = arith.constant 1.000000e+00 : f32
    %203 = vector.broadcast %cst_59 : f32 to vector<8x128xf32>
    %204 = arith.select %202, %203, %200 : vector<8x128xi1>, vector<8x128xf32>
    %205 = math.rsqrt %204 : vector<8x128xf32>
    %cst_60 = arith.constant 0.666666686 : f32
    %206 = vector.broadcast %cst_60 : f32 to vector<8x128xf32>
    %207 = arith.mulf %206, %197 : vector<8x128xf32>
    %208 = arith.mulf %205, %205 : vector<8x128xf32>
    %209 = arith.mulf %208, %205 : vector<8x128xf32>
    %210 = arith.mulf %207, %209 : vector<8x128xf32>
    %cst_61 = arith.constant 0.000000e+00 : f32
    %211 = vector.broadcast %cst_61 : f32 to vector<8x128xf32>
    %212 = arith.select %202, %211, %210 : vector<8x128xi1>, vector<8x128xf32>
    %213 = math.absf %180 : vector<8x128xf32>
    %214 = math.absf %212 : vector<8x128xf32>
    %215 = arith.addf %213, %214 : vector<8x128xf32>
    %cst_62 = arith.constant 0.000000e+00 : f32
    %216 = vector.broadcast %cst_62 : f32 to vector<8x128xf32>
    %217 = arith.select %147, %215, %216 : vector<8x128xi1>, vector<8x128xf32>
    %218 = arith.addf %0, %217 : vector<8x128xf32>
    %c0_63 = arith.constant 0 : index
    %c0_64 = arith.constant 0 : index
    %c0_65 = arith.constant 0 : index
    %219 = vector.load %arg2[%c0_63, %c0_64, %c0_65] : memref<1x8x128xf32, #tpu.memory_space<vmem>>, vector<1x8x128xf32>
    %220 = vector.shape_cast %219 : vector<1x8x128xf32> to vector<8x128xf32>
    %221 = vector.shape_cast %218 : vector<8x128xf32> to vector<1x8x128xf32>
    tpu.vector_store %arg2[%c0_63, %c0_64, %c0_65], %221 {strides = array<i32>} : memref<1x8x128xf32, #tpu.memory_space<vmem>>, vector<1x8x128xf32>,
    return
  }
  func.func @transform_0(%arg0: i32) -> (i32, i32, i32, i32) {
    %c0_i32 = arith.constant 0 : i32
    %c0_i32_0 = arith.constant 0 : i32
    %c0_i32_1 = arith.constant 0 : i32
    %c0_i32_2 = arith.constant 0 : i32
    return %arg0, %c0_i32, %c0_i32_0, %c0_i32_1 : i32, i32, i32, i32
  }
  func.func @transform_1(%arg0: i32) -> (i32, i32, i32) {
    %c0_i32 = arith.constant 0 : i32
    %c0_i32_0 = arith.constant 0 : i32
    %c0_i32_1 = arith.constant 0 : i32
    return %arg0, %c0_i32, %c0_i32_0 : i32, i32, i32
  }
}

</mosaic_0001>

<bundles_post_ra>
// kernel: _joint_loss_pallas.1
= control target key start
LH: loop header
LB: loop body
LE: loop exit
PB: predicated region body
PF: predicated region fallthrough
CT: control target
= control target key end

     0   :  { %s351_s0 = inlined_call_operand.vmem [shape: f32[1,8,8,128], index: 0, kind: input, shape index: {}]   ;;  %s352_s1 = inlined_call_operand.vmem [shape: f32[1,8,128], index: 1, kind: output, shape index: {}]  }
   0x1   :  { %v198_v0 = vld [vmem:[%s351_s0 + $0x10] sm:$0xff]  ;;  %v199_v1 = vld [vmem:[%s351_s0 + $0x18] sm:$0xff]  ;;  %v200_v2 = vld [vmem:[%s351_s0 + $0x20] sm:$0xff] }
   0x2   :  { %v201_v3 = vld [vmem:[%s351_s0 + $0x28] sm:$0xff]  ;;  %v25_v4 = vmul.f32 3.0, %v198_v0  ;;  %v28_v5 = vmul.f32 2.0, %v198_v0  ;;  %v202_v6 = vld [vmem:[%s351_s0 + $0x30] sm:$0xff]  ;;  %v203_v7 = vld [vmem:[%s351_s0 + $0x38] sm:$0xff]  ;;  %v23_v8 = vmul.f32 3.0, %v200_v2 }
   0x3   :  { %v32_v9 = vmul.f32 3.0, %v201_v3  ;;  %v34_v10 = vmul.f32 3.0, %v199_v1  ;;  %v37_v11 = vmul.f32 2.0, %v199_v1  ;;  %v8_v13 = vld [vmem:[%s351_s0] sm:$0xff]  ;;  %v197_v14 = vld [vmem:[%s351_s0 + $0x8] sm:$0xff] }
   0x4   :  { %v29_v12 = vsub.f32 %v200_v2, %v28_v5  ;;  %v24_v15 = vsub.f32 %v202_v6, %v23_v8  ;;  %v251_v21 = vsub.f32 %v198_v0, %v8_v13  ;;  %v255_v23 = vsub.f32 %v199_v1, %v197_v14 }
   0x5   :  { %v33_v16 = vsub.f32 %v203_v7, %v32_v9  ;;  %v38_v17 = vsub.f32 %v201_v3, %v37_v11 }
   0x6   :  { %v26_v18 = vadd.f32 %v25_v4, %v24_v15  ;;  %v249_v20 = vadd.f32 %v29_v12, %v8_v13 }
   0x7   :  { %v35_v19 = vadd.f32 %v34_v10, %v33_v16  ;;  %v253_v22 = vadd.f32 %v197_v14, %v38_v17 }
   0x8   :  { %v257_v24 = vsub.f32 %v26_v18, %v8_v13 }
   0x9   :  { %v259_v25 = vsub.f32 %v35_v19, %v197_v14 }
   0xa   :  { %vm41_vm0 = vcmp.eq.f32.partialorder %v257_v24, 0.0 }
   0xb   :  { %v42_v26 = vsel %vm41_vm0, %v259_v25, %v257_v24  ;;  %v43_v27 = vsel %vm41_vm0, %v253_v22, %v249_v20  ;;  %v44_v28 = vsel %vm41_vm0, %v255_v23, %v251_v21  ;;  %v46_v43 = vsel %vm41_vm0, %v249_v20, %v253_v22 }
   0xc   :  { %v51_v29 = vmul.f32 %v43_v27, %v43_v27  ;;  %v52_v30 = vmul.f32 %v44_v28, %v42_v26  ;;  %vm57_vm1 = vcmp.eq.f32.partialorder %v42_v26, 0.0  ;;  %vm54_vm2 = vcmp.ne.f32.partialorder %v42_v26, 0.0 }
   0xd   :  { %v58_v32 = vsel %vm57_vm1, 1.0, %v42_v26  ;;  %v45_v46 = vsel %vm41_vm0, %v257_v24, %v259_v25  ;;  %v47_v47 = vmul.f32 3.0, %v46_v43  ;;  %v48_v49 = vsel %vm41_vm0, %v251_v21, %v255_v23 }
   0xe   :  { %v53_v31 = vsub.f32 %v51_v29, %v52_v30  ;;  %207 = vrcp.f32 %v58_v32  ;;  %v290_v53 = vmul.f32 3.0, %v48_v49  ;;  %v295_v0 = vsel %vm41_vm0, %v8_v13, %v197_v14 }
  0x10   :  { %vm55_vm3 = vcmp.ge.f32.partialorder %v53_v31, 0.0  ;;  %v63_v33 = vmax.f32 %v53_v31, 0.0 }
  0x11   :  { %vm274_vm4 = vmand %vm54_vm2, %vm55_vm3 }
  0x12   :  { %209 = vrsqrt.f32 %v63_v33  ;;  %vm66_vm5 = vcmp.eq.f32.partialorder %v63_v33, inf  ;;  %v69_v39 = vand.u32 2147483648, %v63_v33  ;;  %vm68_vm6 = vcmp.eq.f32.partialorder %v63_v33, 0.0 }
  0x18   :  { %v208_v35 = vpop.eup %207 }
  0x19   :  { %v60_v36 = vmul.f32 %v208_v35, %v58_v32 }
  0x1b   :  { %v61_v38 = vsub.f32 2.0, %v60_v36 }
  0x1c   :  { %v210_v37 = vpop.eup %209 }
  0x1d   :  { %v65_v40 = vmul.f32 %v210_v37, %v63_v33  ;;  %v62_v41 = vmul.f32 %v208_v35, %v61_v38 }
  0x1f   :  { %v67_v42 = vsel %vm66_vm5, %v63_v33, %v65_v40 }
  0x20   :  { %v70_v44 = vsel %vm68_vm6, %v69_v39, %v67_v42 }
  0x21   :  { %v71_v45 = vsub.f32 %v70_v44, %v43_v27  ;;  %v73_v61 = vsub.f32 0.0, %v70_v44 }
  0x23   :  { %v72_v48 = vmul.f32 %v71_v45, %v62_v41  ;;  %v74_v4 = vsub.f32 %v73_v61, %v43_v27 }
  0x25   :  { %v79_v50 = vmul.f32 %v72_v48, %v45_v46  ;;  %v85_v51 = vadd.f32 0.1, %v72_v48  ;;  %v204_v52 = vadd.f32 -0.1, %v72_v48  ;;  %vm76_vm7 = vcmp.ge.f32.partialorder %v72_v48, 0.0 }
  0x26   :  { %vm77_vm8 = vcmp.le.f32.partialorder %v72_v48, 1.0  ;;  %v302_v10 = vmul.f32 %v74_v4, %v62_v41 }
  0x27   :  { %v80_v54 = vadd.f32 %v79_v50, %v47_v47  ;;  %v86_v55 = vmul.f32 %v85_v51, %v45_v46  ;;  %v94_v56 = vmul.f32 %v204_v52, %v45_v46  ;;  %vm78_vm9 = vmand %vm76_vm7, %vm77_vm8 }
  0x28   :  { %v113_v14 = vadd.f32 0.1, %v302_v10  ;;  %v205_v15 = vadd.f32 -0.1, %v302_v10  ;;  %v107_v16 = vmul.f32 %v302_v10, %v45_v46  ;;  %vm104_vm14 = vcmp.ge.f32.partialorder %v302_v10, 0.0 }
  0x29   :  { %v81_v57 = vmul.f32 %v80_v54, %v72_v48  ;;  %v87_v58 = vadd.f32 %v86_v55, %v47_v47  ;;  %v95_v59 = vadd.f32 %v94_v56, %v47_v47  ;;  %vm105_vm15 = vcmp.le.f32.partialorder %v302_v10, 1.0 }
  0x2a   :  { %v114_v18 = vmul.f32 %v113_v14, %v45_v46  ;;  %v122_v19 = vmul.f32 %v205_v15, %v45_v46  ;;  %v108_v29 = vadd.f32 %v107_v16, %v47_v47  ;;  %vm106_vm0 = vmand %vm104_vm14, %vm105_vm15 }
  0x2b   :  { %v82_v60 = vadd.f32 %v81_v57, %v290_v53  ;;  %v88_v62 = vmul.f32 %v87_v58, %v85_v51  ;;  %v96_v63 = vmul.f32 %v204_v52, %v95_v59 }
  0x2c   :  { %v115_v32 = vadd.f32 %v114_v18, %v47_v47  ;;  %v123_v33 = vadd.f32 %v122_v19, %v47_v47  ;;  %v109_v39 = vmul.f32 %v108_v29, %v302_v10 }
  0x2d   :  { %v83_v1 = vmul.f32 %v82_v60, %v72_v48  ;;  %v89_v2 = vadd.f32 %v88_v62, %v290_v53  ;;  %v97_v3 = vadd.f32 %v96_v63, %v290_v53 }
  0x2e   :  { %v116_v44 = vmul.f32 %v115_v32, %v113_v14  ;;  %v124_v45 = vmul.f32 %v205_v15, %v123_v33 }
  0x2f   :  { %v84_v5 = vadd.f32 %v83_v1, %v295_v0  ;;  %v90_v6 = vmul.f32 %v89_v2, %v85_v51  ;;  %v98_v7 = vmul.f32 %v204_v52, %v97_v3 }
  0x30   :  { %v117_v54 = vadd.f32 %v116_v44, %v290_v53  ;;  %v125_v55 = vadd.f32 %v124_v45, %v290_v53 }
  0x31   :  { %v91_v8 = vadd.f32 %v90_v6, %v295_v0  ;;  %v99_v9 = vadd.f32 %v98_v7, %v295_v0 }
  0x32   :  { %v118_v61 = vmul.f32 %v117_v54, %v113_v14  ;;  %v126_v62 = vmul.f32 %v205_v15, %v125_v55 }
  0x33   :  { %v92_v11 = vsub.f32 %v84_v5, %v91_v8  ;;  %v100_v12 = vsub.f32 %v84_v5, %v99_v9 }
  0x34   :  { %v119_v4 = vadd.f32 %v118_v61, %v295_v0  ;;  %v127_v5 = vadd.f32 %v126_v62, %v295_v0 }
  0x35   :  { %v101_v13 = vmul.f32 %v100_v12, %v92_v11 }
  0x37   :  { %vm102_vm10 = vcmp.gt.f32.partialorder %v101_v13, 0.0 }
  0x38   :  { %vm307_vm11 = vmand %vm78_vm9, %vm102_vm10 }
  0x39   :  { %v134_v26 = vsel %vm307_vm11, %v72_v48, %v302_v10  ;;  %v110_v48 = vadd.f32 %v109_v39, %v290_v53 }
  0x3a   :  { %v206_v27 = vadd.f32 -0.1, %v134_v26  ;;  %v161_v28 = vadd.f32 0.1, %v134_v26 }
  0x3c   :  { %v136_v30 = vmax.f32 %v206_v27, 0.0  ;;  %v162_v31 = vmin.f32 %v161_v28, 1.0 }
  0x3e   :  { %v137_v35 = vmul.f32 %v136_v30, %v257_v24  ;;  %v139_v36 = vmul.f32 %v136_v30, %v259_v25  ;;  %v163_v37 = vmul.f32 %v162_v31, %v257_v24  ;;  %v165_v38 = vmul.f32 %v162_v31, %v259_v25 }
  0x40   :  { %v138_v40 = vadd.f32 %v137_v35, %v249_v20  ;;  %v140_v41 = vadd.f32 %v139_v36, %v253_v22  ;;  %v164_v42 = vadd.f32 %v163_v37, %v249_v20  ;;  %v166_v43 = vadd.f32 %v165_v38, %v253_v22 }
  0x42   :  { %v141_v46 = vadd.f32 %v138_v40, %v249_v20  ;;  %v144_v47 = vadd.f32 %v140_v41, %v253_v22  ;;  %v167_v24 = vadd.f32 %v164_v42, %v249_v20  ;;  %v170_v25 = vadd.f32 %v166_v43, %v253_v22 }
  0x43   :  { %v111_v22 = vmul.f32 %v110_v48, %v302_v10 }
  0x44   :  { %v142_v49 = vmul.f32 %v141_v46, %v136_v30  ;;  %v145_v50 = vmul.f32 %v144_v47, %v136_v30  ;;  %v168_v51 = vmul.f32 %v167_v24, %v162_v31  ;;  %v171_v52 = vmul.f32 %v170_v25, %v162_v31 }
  0x45   :  { %v112_v53 = vadd.f32 %v111_v22, %v295_v0 }
  0x46   :  { %v143_v56 = vadd.f32 %v142_v49, %v251_v21  ;;  %v146_v57 = vadd.f32 %v145_v50, %v255_v23  ;;  %v169_v58 = vadd.f32 %v168_v51, %v251_v21  ;;  %v172_v20 = vadd.f32 %v171_v52, %v255_v23 }
  0x47   :  { %v120_v6 = vsub.f32 %v112_v53, %v119_v4  ;;  %v128_v7 = vsub.f32 %v112_v53, %v127_v5 }
  0x48   :  { %v150_v59 = vmul.f32 %v143_v56, %v143_v56  ;;  %v151_v60 = vmul.f32 %v146_v57, %v146_v57  ;;  %v176_v63 = vmul.f32 %v169_v58, %v169_v58  ;;  %v177_v1 = vmul.f32 %v172_v20, %v172_v20 }
  0x49   :  { %v147_v8 = vmul.f32 %v143_v56, %v140_v41  ;;  %v148_v9 = vmul.f32 %v146_v57, %v138_v40  ;;  %v173_v11 = vmul.f32 %v169_v58, %v166_v43  ;;  %v174_v12 = vmul.f32 %v172_v20, %v164_v42 }
  0x4a   :  { %v152_v2 = vadd.f32 %v151_v60, %v150_v59  ;;  %v178_v3 = vadd.f32 %v177_v1, %v176_v63  ;;  %v129_v13 = vmul.f32 %v128_v7, %v120_v6 }
  0x4b   :  { %v149_v14 = vsub.f32 %v147_v8, %v148_v9  ;;  %v175_v0 = vsub.f32 %v173_v11, %v174_v12 }
  0x4c   :  { %vm153_vm12 = vcmp.eq.f32.partialorder %v152_v2, 0.0  ;;  %vm179_vm13 = vcmp.eq.f32.partialorder %v178_v3, 0.0  ;;  %vm130_vm1 = vcmp.gt.f32.partialorder %v129_v13, 0.0 }
  0x4d   :  { %v154_v21 = vsel %vm153_vm12, 1.0, %v152_v2  ;;  %v180_v23 = vsel %vm179_vm13, 1.0, %v178_v3  ;;  %v156_v18 = vmul.f32 0.6666667, %v149_v14  ;;  %v182_v26 = vmul.f32 0.6666667, %v175_v0  ;;  %vm131_vm2 = vmand %vm106_vm0, %vm130_vm1 }
  0x4e   :  { %211 = vrsqrt.f32 %v154_v21  ;;  %vm132_vm3 = vmor %vm307_vm11, %vm131_vm2 }
  0x4f   :  { %213 = vrsqrt.f32 %v180_v23  ;;  %vm133_vm5 = vmand %vm274_vm4, %vm132_vm3 }
  0x58   :  { %v212_v15 = vpop.eup %211 }
  0x59   :  { %v214_v16 = vpop.eup %213  ;;  %v157_v19 = vmul.f32 %v212_v15, %v212_v15 }
  0x5a   :  { %v183_v27 = vmul.f32 %v214_v16, %v214_v16 }
  0x5b   :  { %v158_v28 = vmul.f32 %v212_v15, %v157_v19 }
  0x5c   :  { %v184_v29 = vmul.f32 %v214_v16, %v183_v27 }
  0x5d   :  { %v159_v30 = vmul.f32 %v158_v28, %v156_v18 }
  0x5e   :  { %v185_v31 = vmul.f32 %v184_v29, %v182_v26 }
  0x5f   :  { %v160_v32 = vsel %vm153_vm12, 0.0, %v159_v30 }
  0x60   :  { %v186_v10 = vsel %vm179_vm13, 0.0, %v185_v31  ;;  %v187_v33 = vand.u32 2147483647, %v160_v32 }
  0x61   :  { %v188_v35 = vand.u32 2147483647, %v186_v10 }
  0x63   :  { %v189_v36 = vadd.f32 %v188_v35, %v187_v33 }
  0x65   :  { %v190_v37 = vsel %vm133_vm5, %v189_v36, 0.0 }
  0x66   :  { %192 = vst [vmem:[%s352_s1] sm:$0xff] %v190_v37 }

</bundles_post_ra>
